<compile_context>
chip_gen: v6e
topology: v6e:2x2x1
jax: 0.10.0
libtpu: 0.0.40
codegen_flags: <defaults>
</compile_context>

<pallas_src>
import functools

import jax
import jax.numpy as jnp
from jax.experimental import pallas as pl
from jax.experimental.pallas import tpu as pltpu


_BN_EPS = 1e-5
_LANE = 128
_T_TILE_MAX = 256
_VMEM_LIMIT_BYTES = 40 * 1024 * 1024   # explicit budget, safe on v5e/v6e/v7x


def _round_up(x, m):
    return (x + m - 1) // m * m


# ----------------------------------------------------------------------------
# Kernel 1: fused conv (+folded BN + Swish), residual conv (+folded BN) and
#           masked SE pooled partial sums.   grid = (B, num_time_tiles)
# ----------------------------------------------------------------------------
def _fused_conv_se_pool_kernel(lens_ref, x_ref, wm_ref, shm_ref, wr_ref,
                               shr_ref, y_ref, r_ref, psum_ref,
                               *, k_size, stride, t_tile, has_residual):
    """lens_ref: (B,) int32 SMEM   valid OUTPUT lengths per example
    x_ref:    (1, T_in_pad, Cin_p)  bf16, full time axis for batch b
    wm_ref:   (K, Cin_p, Cout_p)    bf16  main conv, BN folded
    shm_ref:  (1, Cout_p)           f32   main folded shift (bias+BN)
    wr_ref:   (K, Cin_p, Cout_p)    bf16  residual conv, BN folded
    shr_ref:  (1, Cout_p)           f32
    y_ref:    (1, t_tile, Cout_p)   bf16  conv+BN+Swish output tile
    r_ref:    (1, t_tile, Cout_p)   bf16  residual conv output tile
    psum_ref: (1, 1, 1, Cout_p)     f32   masked per-tile pooled sum of y
    """
    b = pl.program_id(0)
    j = pl.program_id(1)
    cout = y_ref.shape[2]

    # Load the halo'd input window for this output tile once.
    win = (t_tile - 1) * stride + k_size
    base = pl.multiple_of(j * (t_tile * stride), t_tile * stride)
    xwin = x_ref[0, pl.ds(base, win), :]                     # (win, Cin_p) bf16

    acc_m = jnp.zeros((t_tile, cout), jnp.float32)
    acc_r = jnp.zeros((t_tile, cout), jnp.float32)
    lim = (t_tile - 1) * stride + 1
    for k in range(k_size):                                  # static unroll
        if stride == 1:
            xs = xwin[k:k + t_tile, :]
        else:
            # only strided output rows are computed (in-kernel stride)
            xs = xwin[k:k + lim:stride, :]
        acc_m += jnp.dot(xs, wm_ref[k], preferred_element_type=jnp.float32)
        if has_residual:
            acc_r += jnp.dot(xs, wr_ref[k], preferred_element_type=jnp.float32)

    y = acc_m + shm_ref[...]                                 # folded bias + BN
    y = y * jax.nn.sigmoid(y)                                # Swish (f32, EUP)
    r = acc_r + shr_ref[...] if has_residual else acc_r      # residual (no act)

    # Masked pooled partial sum for SE (only valid frames of this example).
    row = j * t_tile + jax.lax.broadcasted_iota(jnp.int32, (t_tile, 1), 0)
    mask = (row < lens_ref[b]).astype(jnp.float32)
    psum_ref[0, 0] = jnp.sum(y * mask, axis=0, keepdims=True)

    y_ref[0] = y.astype(y_ref.dtype)
    r_ref[0] = r.astype(r_ref.dtype)


# ----------------------------------------------------------------------------
# Kernel 2: SE gate MLP, batched over B (single invocation, whole arrays).
# ----------------------------------------------------------------------------
def _se_gate_kernel(psum_ref, invlen_ref, w1_ref, b1_ref, w2_ref, b2_ref,
                    g_ref):
    """psum_ref: (B, Tiles, 1, Cout_p) f32; invlen_ref: (B, 1) f32
    w1/b1/w2/b2: SE MLP params (zero-padded); g_ref: (B, 1, Cout_p) f32."""
    pooled = jnp.sum(psum_ref[...], axis=(1, 2)) * invlen_ref[...]   # (B, Cp)
    h = jnp.dot(pooled, w1_ref[...],
                preferred_element_type=jnp.float32) + b1_ref[...]
    h = h * jax.nn.sigmoid(h)                                        # Swish
    s = jnp.dot(h, w2_ref[...],
                preferred_element_type=jnp.float32) + b2_ref[...]
    g_ref[...] = jax.nn.sigmoid(s)[:, None, :]                       # (B,1,Cp)


# ----------------------------------------------------------------------------
# Kernel 3: apply SE gate + residual add.   grid = (B, num_time_tiles)
# ----------------------------------------------------------------------------
def _apply_gate_kernel(y_ref, r_ref, g_ref, o_ref):
    y = y_ref[0].astype(jnp.float32)
    r = r_ref[0].astype(jnp.float32)
    o_ref[0] = (y * g_ref[0] + r).astype(o_ref.dtype)


# ----------------------------------------------------------------------------
# Parameter construction + weight preparation
# ----------------------------------------------------------------------------
def _make_conv_params(key, in_ch, out_ch, k_size):
    kw, kb, km = jax.random.split(key, 3)
    w = 0.1 * jax.random.normal(kw, (out_ch, in_ch, k_size), jnp.float32)
    bias = 0.1 * jax.random.normal(kb, (out_ch,), jnp.float32)
    gamma = jnp.ones((out_ch,), jnp.float32)
    beta = jnp.zeros((out_ch,), jnp.float32)
    r_mean = 0.01 * jax.random.normal(km, (out_ch,), jnp.float32)
    r_var = jnp.ones((out_ch,), jnp.float32)
    return dict(w=w, bias=bias, gamma=gamma, beta=beta,
                r_mean=r_mean, r_var=r_var)


def _prep_conv_folded(p, cin_p, cout_p):
    """PyTorch (Cout,Cin,K) weight -> (K,Cin_p,Cout_p) bf16 with conv bias and
    eval-mode BatchNorm folded in; returns (weights, shift)."""
    w_kio = jnp.transpose(p["w"], (2, 1, 0))                     # (K, Cin, Cout)
    scale = p["gamma"] / jnp.sqrt(p["r_var"] + _BN_EPS)
    shift = p["beta"] - p["r_mean"] * scale + p["bias"] * scale  # bias folded
    w_fold = w_kio * scale[None, None, :]
    k, cin, cout = w_fold.shape
    w_fold = jnp.pad(w_fold, ((0, 0), (0, cin_p - cin),
                              (0, cout_p - cout))).astype(jnp.bfloat16)
    shift = jnp.pad(shift, (0, cout_p - cout)).reshape(1, cout_p)
    return w_fold, shift.astype(jnp.float32)


def make_conv_block_params(key, in_channels, out_channels, num_layers,
                           kernel_size):
    keys = jax.random.split(key, num_layers + 3)
    in_ch_list = [in_channels] + [out_channels] * (num_layers - 1)
    conv_layers = [_make_conv_params(keys[i], in_ch_list[i], out_channels,
                                     kernel_size) for i in range(num_layers)]
    residual = _make_conv_params(keys[num_layers], in_channels, out_channels,
                                 kernel_size)
    cb = out_channels // 8
    k1, k2 = keys[num_layers + 1], keys[num_layers + 2]
    se_w1 = 0.1 * jax.random.normal(k1, (out_channels, cb), jnp.float32)
    se_b1 = jnp.zeros((1, cb), jnp.float32)
    se_w2 = 0.1 * jax.random.normal(k2, (cb, out_channels), jnp.float32)
    se_b2 = jnp.zeros((1, out_channels), jnp.float32)
    return dict(conv_layers=conv_layers, residual=residual,
                se=dict(w1=se_w1, b1=se_b1, w2=se_w2, b2=se_b2))


# ----------------------------------------------------------------------------
# ConvBlock forward
# ----------------------------------------------------------------------------
def conv_block_forward(params, inputs_ncl, input_lengths, *, kernel_size=5,
                       stride=1, padding=0, num_layers=5, residual=True):
    """inputs_ncl: (B, C_in, L) float32; input_lengths: (B,) int32."""
    assert padding == 0, "module is always constructed with padding=0"
    B, c_in, L = inputs_ncl.shape
    c_out = params["conv_layers"][-1]["w"].shape[0]

    t_out = (L + 2 * padding - kernel_size) // stride + 1
    out_lens = ((input_lengths + 2 * padding - kernel_size) // stride
                + 1).astype(jnp.int32)

    # --- padding / tiling decisions ----------------------------------------
    cin_p = _round_up(c_in, _LANE)
    cout_p = _round_up(c_out, _LANE)
    t_tile = min(_T_TILE_MAX, _round_up(t_out, 16))   # 16: bf16 sublane packing
    n_tiles = -(-t_out // t_tile)
    t_out_p = n_tiles * t_tile
    t_in_p = n_tiles * t_tile * stride + kernel_size - 1

    x_btc = jnp.transpose(inputs_ncl, (0, 2, 1))                  # (B, L, Cin)
    x_p = jnp.pad(x_btc, ((0, 0), (0, t_in_p - L),
                          (0, cin_p - c_in))).astype(jnp.bfloat16)

    # Faithful to the source loop: only the LAST conv layer survives.
    last = num_layers - 1
    wm, shm = _prep_conv_folded(params["conv_layers"][last], cin_p, cout_p)
    if residual:
        wr, shr = _prep_conv_folded(params["residual"], cin_p, cout_p)
    else:
        wr = jnp.zeros_like(wm)
        shr = jnp.zeros((1, cout_p), jnp.float32)

    cparams = pltpu.CompilerParams(
        dimension_semantics=("parallel", "parallel"),
        vmem_limit_bytes=_VMEM_LIMIT_BYTES)

    # --- pass 1: fused convs + masked SE pooled partial sums ---------------
    kern1 = functools.partial(_fused_conv_se_pool_kernel, k_size=kernel_size,
                              stride=stride, t_tile=t_tile,
                              has_residual=residual)
    y, r, psum = pl.pallas_call(
        kern1,
        out_shape=(
            jax.ShapeDtypeStruct((B, t_out_p, cout_p), jnp.bfloat16),
            jax.ShapeDtypeStruct((B, t_out_p, cout_p), jnp.bfloat16),
            jax.ShapeDtypeStruct((B, n_tiles, 1, cout_p), jnp.float32),
        ),
        grid=(B, n_tiles),
        in_specs=[
            pl.BlockSpec(memory_space=pltpu.MemorySpace.SMEM),       # out_lens
            pl.BlockSpec((1, t_in_p, cin_p), lambda b, j: (b, 0, 0)),
            pl.BlockSpec((kernel_size, cin_p, cout_p), lambda b, j: (0, 0, 0)),
            pl.BlockSpec((1, cout_p), lambda b, j: (0, 0)),
            pl.BlockSpec((kernel_size, cin_p, cout_p), lambda b, j: (0, 0, 0)),
            pl.BlockSpec((1, cout_p), lambda b, j: (0, 0)),
        ],
        out_specs=(
            pl.BlockSpec((1, t_tile, cout_p), lambda b, j: (b, j, 0)),
            pl.BlockSpec((1, t_tile, cout_p), lambda b, j: (b, j, 0)),
            pl.BlockSpec((1, 1, 1, cout_p), lambda b, j: (b, j, 0, 0)),
        ),
        compiler_params=cparams,
    )(out_lens, x_p, wm, shm, wr, shr)

    # --- pass 2: SE gate MLP (batched over B, one tiny invocation) ---------
    se = params["se"]
    cb = se["w1"].shape[1]
    cb_p = _round_up(cb, _LANE)
    w1_p = jnp.pad(se["w1"], ((0, cout_p - c_out), (0, cb_p - cb)))
    b1_p = jnp.pad(se["b1"], ((0, 0), (0, cb_p - cb)))
    w2_p = jnp.pad(se["w2"], ((0, cb_p - cb), (0, cout_p - c_out)))
    b2_p = jnp.pad(se["b2"], ((0, 0), (0, cout_p - c_out)))
    inv_len = (1.0 / out_lens.astype(jnp.float32)).reshape(B, 1)

    gate = pl.pallas_call(
        _se_gate_kernel,
        out_shape=jax.ShapeDtypeStruct((B, 1, cout_p), jnp.float32),
    )(psum, inv_len, w1_p, b1_p, w2_p, b2_p)

    # --- pass 3: apply gate + residual add (lane-dense stores) -------------
    out = pl.pallas_call(
        _apply_gate_kernel,
        out_shape=jax.ShapeDtypeStruct((B, t_out_p, cout_p), jnp.float32),
        grid=(B, n_tiles),
        in_specs=[
            pl.BlockSpec((1, t_tile, cout_p), lambda b, j: (b, j, 0)),
            pl.BlockSpec((1, t_tile, cout_p), lambda b, j: (b, j, 0)),
            pl.BlockSpec((1, 1, cout_p), lambda b, j: (b, 0, 0)),
        ],
        out_specs=pl.BlockSpec((1, t_tile, cout_p), lambda b, j: (b, j, 0)),
        compiler_params=cparams,
    )(y, r, gate)

    out = out[:, :t_out, :c_out]                         # drop pad rows/chans
    return jnp.transpose(out, (0, 2, 1)), out_lens       # back to NCL


# ----------------------------------------------------------------------------
if __name__ == "__main__":
    B, C_IN, C_OUT, T = 2, 16, 16, 32
    NUM_LAYERS, K, STRIDE, PADDING = 5, 5, 1, 0

    key = jax.random.PRNGKey(0)
    k_in, k_par = jax.random.split(key)
    x = jax.random.normal(k_in, (B, C_IN, T), jnp.float32)        # NCL
    input_lengths = jnp.array([T, T - 7], dtype=jnp.int32)

    params = make_conv_block_params(k_par, C_IN, C_OUT, NUM_LAYERS, K)

    out, out_lens = conv_block_forward(
        params, x, input_lengths,
        kernel_size=K, stride=STRIDE, padding=PADDING,
        num_layers=NUM_LAYERS, residual=True)
    out = jax.block_until_ready(out)
    out_lens = jax.block_until_ready(out_lens)

    expected_t = (T - K) // STRIDE + 1
    assert out.shape == (B, C_OUT, expected_t), out.shape
    assert bool(jnp.all(jnp.isfinite(out)))
    assert out_lens.shape == (B,)
    print("KERNEL_OK")
</pallas_src>

<mosaic_0001>
module attributes {stable_mosaic.version = 11 : i64} {
  func.func @_fused_conv_se_pool_kernel(%arg0: i32, %arg1: i32, %arg2: memref<2xi32, #tpu.memory_space<smem>>, %arg3: memref<1x36x128xbf16, #tpu.memory_space<vmem>>, %arg4: memref<5x128x128xbf16, #tpu.memory_space<vmem>>, %arg5: memref<1x128xf32, #tpu.memory_space<vmem>>, %arg6: memref<5x128x128xbf16, #tpu.memory_space<vmem>>, %arg7: memref<1x128xf32, #tpu.memory_space<vmem>>, %arg8: memref<1x32x128xbf16, #tpu.memory_space<vmem>>, %arg9: memref<1x32x128xbf16, #tpu.memory_space<vmem>>, %arg10: memref<1x1x1x128xf32, #tpu.memory_space<vmem>>) attributes {dimension_semantics = [#tpu.dimension_semantics<parallel>, #tpu.dimension_semantics<parallel>], iteration_bounds = array<i64: 2, 1>, scalar_prefetch = 0 : i64, scratch_operands = 0 : i64, tpu.core_type = #tpu.core_type<tc>, window_params = [{transform_indices = @transform_0, window_bounds = array<i64: 2>}, {transform_indices = @transform_1, window_bounds = array<i64: 1, 36, 128>}, {pipeline_mode = #tpu.pipeline_mode<synchronous>, transform_indices = @transform_2, window_bounds = array<i64: 5, 128, 128>}, {pipeline_mode = #tpu.pipeline_mode<synchronous>, transform_indices = @transform_3, window_bounds = array<i64: 1, 128>}, {pipeline_mode = #tpu.pipeline_mode<synchronous>, transform_indices = @transform_4, window_bounds = array<i64: 5, 128, 128>}, {pipeline_mode = #tpu.pipeline_mode<synchronous>, transform_indices = @transform_5, window_bounds = array<i64: 1, 128>}, {transform_indices = @transform_6, window_bounds = array<i64: 1, 32, 128>}, {transform_indices = @transform_7, window_bounds = array<i64: 1, 32, 128>}, {transform_indices = @transform_8, window_bounds = array<i64: 1, 1, 1, 128>}]} {
    %c32_i32 = arith.constant 32 : i32
    %0 = arith.muli %arg1, %c32_i32 : i32
    %1 = tpu.assume_multiple %0, 32 : i32
    %c0 = arith.constant 0 : index
    %2 = arith.index_cast %1 : i32 to index
    %c0_0 = arith.constant 0 : index
    %3 = vector.load %arg3[%c0, %2, %c0_0] : memref<1x36x128xbf16, #tpu.memory_space<vmem>>, vector<1x36x128xbf16>
    %4 = vector.shape_cast %3 : vector<1x36x128xbf16> to vector<36x128xbf16>
    %cst = arith.constant 0.000000e+00 : f32
    %5 = vector.broadcast %cst : f32 to vector<32x128xf32>
    %cst_1 = arith.constant 0.000000e+00 : f32
    %6 = vector.broadcast %cst_1 : f32 to vector<32x128xf32>
    %7 = vector.extract_strided_slice %4 {offsets = [0, 0], sizes = [32, 128], strides = [1, 1]} : vector<36x128xbf16> to vector<32x128xbf16>
    %c0_2 = arith.constant 0 : index
    %c0_3 = arith.constant 0 : index
    %c0_4 = arith.constant 0 : index
    %8 = vector.load %arg4[%c0_2, %c0_3, %c0_4] : memref<5x128x128xbf16, #tpu.memory_space<vmem>>, vector<1x128x128xbf16>
    %9 = vector.shape_cast %8 : vector<1x128x128xbf16> to vector<128x128xbf16>
    %cst_5 = arith.constant dense<0.000000e+00> : vector<32x128xf32>
    %10 = tpu.matmul %7, %9, %cst_5 {dimension_numbers = #tpu.dot_dimension_numbers<[1], [0], [0], [1], [0, 0, 1, 1], [], []>} : vector<32x128xbf16>, vector<128x128xbf16>, vector<32x128xf32> -> vector<32x128xf32>
    %11 = arith.addf %5, %10 : vector<32x128xf32>
    %c0_6 = arith.constant 0 : index
    %c0_7 = arith.constant 0 : index
    %c0_8 = arith.constant 0 : index
    %12 = vector.load %arg6[%c0_6, %c0_7, %c0_8] : memref<5x128x128xbf16, #tpu.memory_space<vmem>>, vector<1x128x128xbf16>
    %13 = vector.shape_cast %12 : vector<1x128x128xbf16> to vector<128x128xbf16>
    %cst_9 = arith.constant dense<0.000000e+00> : vector<32x128xf32>
    %14 = tpu.matmul %7, %13, %cst_9 {dimension_numbers = #tpu.dot_dimension_numbers<[1], [0], [0], [1], [0, 0, 1, 1], [], []>} : vector<32x128xbf16>, vector<128x128xbf16>, vector<32x128xf32> -> vector<32x128xf32>
    %15 = arith.addf %6, %14 : vector<32x128xf32>
    %16 = vector.extract_strided_slice %4 {offsets = [1, 0], sizes = [32, 128], strides = [1, 1]} : vector<36x128xbf16> to vector<32x128xbf16>
    %c1 = arith.constant 1 : index
    %c0_10 = arith.constant 0 : index
    %c0_11 = arith.constant 0 : index
    %17 = vector.load %arg4[%c1, %c0_10, %c0_11] : memref<5x128x128xbf16, #tpu.memory_space<vmem>>, vector<1x128x128xbf16>
    %18 = vector.shape_cast %17 : vector<1x128x128xbf16> to vector<128x128xbf16>
    %cst_12 = arith.constant dense<0.000000e+00> : vector<32x128xf32>
    %19 = tpu.matmul %16, %18, %cst_12 {dimension_numbers = #tpu.dot_dimension_numbers<[1], [0], [0], [1], [0, 0, 1, 1], [], []>} : vector<32x128xbf16>, vector<128x128xbf16>, vector<32x128xf32> -> vector<32x128xf32>
    %20 = arith.addf %11, %19 : vector<32x128xf32>
    %c1_13 = arith.constant 1 : index
    %c0_14 = arith.constant 0 : index
    %c0_15 = arith.constant 0 : index
    %21 = vector.load %arg6[%c1_13, %c0_14, %c0_15] : memref<5x128x128xbf16, #tpu.memory_space<vmem>>, vector<1x128x128xbf16>
    %22 = vector.shape_cast %21 : vector<1x128x128xbf16> to vector<128x128xbf16>
    %cst_16 = arith.constant dense<0.000000e+00> : vector<32x128xf32>
    %23 = tpu.matmul %16, %22, %cst_16 {dimension_numbers = #tpu.dot_dimension_numbers<[1], [0], [0], [1], [0, 0, 1, 1], [], []>} : vector<32x128xbf16>, vector<128x128xbf16>, vector<32x128xf32> -> vector<32x128xf32>
    %24 = arith.addf %15, %23 : vector<32x128xf32>
    %25 = vector.extract_strided_slice %4 {offsets = [2, 0], sizes = [32, 128], strides = [1, 1]} : vector<36x128xbf16> to vector<32x128xbf16>
    %c2 = arith.constant 2 : index
    %c0_17 = arith.constant 0 : index
    %c0_18 = arith.constant 0 : index
    %26 = vector.load %arg4[%c2, %c0_17, %c0_18] : memref<5x128x128xbf16, #tpu.memory_space<vmem>>, vector<1x128x128xbf16>
    %27 = vector.shape_cast %26 : vector<1x128x128xbf16> to vector<128x128xbf16>
    %cst_19 = arith.constant dense<0.000000e+00> : vector<32x128xf32>
    %28 = tpu.matmul %25, %27, %cst_19 {dimension_numbers = #tpu.dot_dimension_numbers<[1], [0], [0], [1], [0, 0, 1, 1], [], []>} : vector<32x128xbf16>, vector<128x128xbf16>, vector<32x128xf32> -> vector<32x128xf32>
    %29 = arith.addf %20, %28 : vector<32x128xf32>
    %c2_20 = arith.constant 2 : index
    %c0_21 = arith.constant 0 : index
    %c0_22 = arith.constant 0 : index
    %30 = vector.load %arg6[%c2_20, %c0_21, %c0_22] : memref<5x128x128xbf16, #tpu.memory_space<vmem>>, vector<1x128x128xbf16>
    %31 = vector.shape_cast %30 : vector<1x128x128xbf16> to vector<128x128xbf16>
    %cst_23 = arith.constant dense<0.000000e+00> : vector<32x128xf32>
    %32 = tpu.matmul %25, %31, %cst_23 {dimension_numbers = #tpu.dot_dimension_numbers<[1], [0], [0], [1], [0, 0, 1, 1], [], []>} : vector<32x128xbf16>, vector<128x128xbf16>, vector<32x128xf32> -> vector<32x128xf32>
    %33 = arith.addf %24, %32 : vector<32x128xf32>
    %34 = vector.extract_strided_slice %4 {offsets = [3, 0], sizes = [32, 128], strides = [1, 1]} : vector<36x128xbf16> to vector<32x128xbf16>
    %c3 = arith.constant 3 : index
    %c0_24 = arith.constant 0 : index
    %c0_25 = arith.constant 0 : index
    %35 = vector.load %arg4[%c3, %c0_24, %c0_25] : memref<5x128x128xbf16, #tpu.memory_space<vmem>>, vector<1x128x128xbf16>
    %36 = vector.shape_cast %35 : vector<1x128x128xbf16> to vector<128x128xbf16>
    %cst_26 = arith.constant dense<0.000000e+00> : vector<32x128xf32>
    %37 = tpu.matmul %34, %36, %cst_26 {dimension_numbers = #tpu.dot_dimension_numbers<[1], [0], [0], [1], [0, 0, 1, 1], [], []>} : vector<32x128xbf16>, vector<128x128xbf16>, vector<32x128xf32> -> vector<32x128xf32>
    %38 = arith.addf %29, %37 : vector<32x128xf32>
    %c3_27 = arith.constant 3 : index
    %c0_28 = arith.constant 0 : index
    %c0_29 = arith.constant 0 : index
    %39 = vector.load %arg6[%c3_27, %c0_28, %c0_29] : memref<5x128x128xbf16, #tpu.memory_space<vmem>>, vector<1x128x128xbf16>
    %40 = vector.shape_cast %39 : vector<1x128x128xbf16> to vector<128x128xbf16>
    %cst_30 = arith.constant dense<0.000000e+00> : vector<32x128xf32>
    %41 = tpu.matmul %34, %40, %cst_30 {dimension_numbers = #tpu.dot_dimension_numbers<[1], [0], [0], [1], [0, 0, 1, 1], [], []>} : vector<32x128xbf16>, vector<128x128xbf16>, vector<32x128xf32> -> vector<32x128xf32>
    %42 = arith.addf %33, %41 : vector<32x128xf32>
    %43 = vector.extract_strided_slice %4 {offsets = [4, 0], sizes = [32, 128], strides = [1, 1]} : vector<36x128xbf16> to vector<32x128xbf16>
    %c4 = arith.constant 4 : index
    %c0_31 = arith.constant 0 : index
    %c0_32 = arith.constant 0 : index
    %44 = vector.load %arg4[%c4, %c0_31, %c0_32] : memref<5x128x128xbf16, #tpu.memory_space<vmem>>, vector<1x128x128xbf16>
    %45 = vector.shape_cast %44 : vector<1x128x128xbf16> to vector<128x128xbf16>
    %cst_33 = arith.constant dense<0.000000e+00> : vector<32x128xf32>
    %46 = tpu.matmul %43, %45, %cst_33 {dimension_numbers = #tpu.dot_dimension_numbers<[1], [0], [0], [1], [0, 0, 1, 1], [], []>} : vector<32x128xbf16>, vector<128x128xbf16>, vector<32x128xf32> -> vector<32x128xf32>
    %47 = arith.addf %38, %46 : vector<32x128xf32>
    %c4_34 = arith.constant 4 : index
    %c0_35 = arith.constant 0 : index
    %c0_36 = arith.constant 0 : index
    %48 = vector.load %arg6[%c4_34, %c0_35, %c0_36] : memref<5x128x128xbf16, #tpu.memory_space<vmem>>, vector<1x128x128xbf16>
    %49 = vector.shape_cast %48 : vector<1x128x128xbf16> to vector<128x128xbf16>
    %cst_37 = arith.constant dense<0.000000e+00> : vector<32x128xf32>
    %50 = tpu.matmul %43, %49, %cst_37 {dimension_numbers = #tpu.dot_dimension_numbers<[1], [0], [0], [1], [0, 0, 1, 1], [], []>} : vector<32x128xbf16>, vector<128x128xbf16>, vector<32x128xf32> -> vector<32x128xf32>
    %51 = arith.addf %42, %50 : vector<32x128xf32>
    %c0_38 = arith.constant 0 : index
    %c0_39 = arith.constant 0 : index
    %52 = vector.load %arg5[%c0_38, %c0_39] : memref<1x128xf32, #tpu.memory_space<vmem>>, vector<1x128xf32>
    %53 = vector.broadcast %52 : vector<1x128xf32> to vector<32x128xf32>
    %54 = arith.addf %47, %53 : vector<32x128xf32>
    %55 = arith.negf %54 : vector<32x128xf32>
    %56 = math.exp %55 : vector<32x128xf32>
    %cst_40 = arith.constant 1.000000e+00 : f32
    %57 = vector.broadcast %cst_40 : f32 to vector<32x128xf32>
    %58 = arith.addf %57, %56 : vector<32x128xf32>
    %59 = arith.divf %57, %58 : vector<32x128xf32>
    %60 = arith.mulf %54, %59 : vector<32x128xf32>
    %c0_41 = arith.constant 0 : index
    %c0_42 = arith.constant 0 : index
    %61 = vector.load %arg7[%c0_41, %c0_42] : memref<1x128xf32, #tpu.memory_space<vmem>>, vector<1x128xf32>
    %62 = vector.broadcast %61 : vector<1x128xf32> to vector<32x128xf32>
    %63 = arith.addf %51, %62 : vector<32x128xf32>
    %c32_i32_43 = arith.constant 32 : i32
    %64 = arith.muli %arg1, %c32_i32_43 : i32
    %65 = tpu.iota {dimensions = array<i32: 0>} : vector<32x1xi32>
    %66 = vector.broadcast %64 : i32 to vector<32x1xi32>
    %67 = arith.addi %66, %65 : vector<32x1xi32>
    %68 = arith.index_cast %arg0 : i32 to index
    %69 = memref.load %arg2[%68] : memref<2xi32, #tpu.memory_space<smem>>
    %70 = vector.broadcast %69 : i32 to vector<32x1xi32>
    %71 = arith.cmpi slt, %67, %70 : vector<32x1xi32>
    %72 = arith.extui %71 : vector<32x1xi1> to vector<32x1xi32>
    %73 = arith.sitofp %72 : vector<32x1xi32> to vector<32x1xf32>
    %74 = vector.broadcast %73 : vector<32x1xf32> to vector<32x128xf32>
    %75 = arith.mulf %60, %74 : vector<32x128xf32>
    %cst_44 = arith.constant dense<0.000000e+00> : vector<128xf32>
    %76 = vector.multi_reduction <add>, %75, %cst_44 [0] : vector<32x128xf32> to vector<128xf32>
    %77 = vector.shape_cast %76 : vector<128xf32> to vector<1x128xf32>
    %c0_45 = arith.constant 0 : index
    %c0_46 = arith.constant 0 : index
    %c0_47 = arith.constant 0 : index
    %c0_48 = arith.constant 0 : index
    %78 = vector.load %arg10[%c0_45, %c0_46, %c0_47, %c0_48] : memref<1x1x1x128xf32, #tpu.memory_space<vmem>>, vector<1x1x1x128xf32>
    %79 = vector.shape_cast %78 : vector<1x1x1x128xf32> to vector<1x128xf32>
    %80 = vector.shape_cast %77 : vector<1x128xf32> to vector<1x1x1x128xf32>
    tpu.vector_store %arg10[%c0_45, %c0_46, %c0_47, %c0_48], %80 {strides = array<i32>} : memref<1x1x1x128xf32, #tpu.memory_space<vmem>>, vector<1x1x1x128xf32>,
    %81 = arith.truncf %60 : vector<32x128xf32> to vector<32x128xbf16>
    %c0_49 = arith.constant 0 : index
    %c0_50 = arith.constant 0 : index
    %c0_51 = arith.constant 0 : index
    %82 = vector.load %arg8[%c0_49, %c0_50, %c0_51] : memref<1x32x128xbf16, #tpu.memory_space<vmem>>, vector<1x32x128xbf16>
    %83 = vector.shape_cast %82 : vector<1x32x128xbf16> to vector<32x128xbf16>
    %84 = vector.shape_cast %81 : vector<32x128xbf16> to vector<1x32x128xbf16>
    tpu.vector_store %arg8[%c0_49, %c0_50, %c0_51], %84 {strides = array<i32>} : memref<1x32x128xbf16, #tpu.memory_space<vmem>>, vector<1x32x128xbf16>,
    %85 = arith.truncf %63 : vector<32x128xf32> to vector<32x128xbf16>
    %c0_52 = arith.constant 0 : index
    %c0_53 = arith.constant 0 : index
    %c0_54 = arith.constant 0 : index
    %86 = vector.load %arg9[%c0_52, %c0_53, %c0_54] : memref<1x32x128xbf16, #tpu.memory_space<vmem>>, vector<1x32x128xbf16>
    %87 = vector.shape_cast %86 : vector<1x32x128xbf16> to vector<32x128xbf16>
    %88 = vector.shape_cast %85 : vector<32x128xbf16> to vector<1x32x128xbf16>
    tpu.vector_store %arg9[%c0_52, %c0_53, %c0_54], %88 {strides = array<i32>} : memref<1x32x128xbf16, #tpu.memory_space<vmem>>, vector<1x32x128xbf16>,
    return
  }
  func.func @transform_0(%arg0: i32, %arg1: i32) -> i32 {
    %c0_i32 = arith.constant 0 : i32
    %c0_i32_0 = arith.constant 0 : i32
    return %c0_i32 : i32
  }
  func.func @transform_1(%arg0: i32, %arg1: i32) -> (i32, i32, i32) {
    %c0_i32 = arith.constant 0 : i32
    %c0_i32_0 = arith.constant 0 : i32
    %c0_i32_1 = arith.constant 0 : i32
    return %arg0, %c0_i32, %c0_i32_0 : i32, i32, i32
  }
  func.func @transform_2(%arg0: i32, %arg1: i32) -> (i32, i32, i32) {
    %c0_i32 = arith.constant 0 : i32
    %c0_i32_0 = arith.constant 0 : i32
    %c0_i32_1 = arith.constant 0 : i32
    %c0_i32_2 = arith.constant 0 : i32
    return %c0_i32, %c0_i32_0, %c0_i32_1 : i32, i32, i32
  }
  func.func @transform_3(%arg0: i32, %arg1: i32) -> (i32, i32) {
    %c0_i32 = arith.constant 0 : i32
    %c0_i32_0 = arith.constant 0 : i32
    %c0_i32_1 = arith.constant 0 : i32
    return %c0_i32, %c0_i32_0 : i32, i32
  }
  func.func @transform_4(%arg0: i32, %arg1: i32) -> (i32, i32, i32) {
    %c0_i32 = arith.constant 0 : i32
    %c0_i32_0 = arith.constant 0 : i32
    %c0_i32_1 = arith.constant 0 : i32
    %c0_i32_2 = arith.constant 0 : i32
    return %c0_i32, %c0_i32_0, %c0_i32_1 : i32, i32, i32
  }
  func.func @transform_5(%arg0: i32, %arg1: i32) -> (i32, i32) {
    %c0_i32 = arith.constant 0 : i32
    %c0_i32_0 = arith.constant 0 : i32
    %c0_i32_1 = arith.constant 0 : i32
    return %c0_i32, %c0_i32_0 : i32, i32
  }
  func.func @transform_6(%arg0: i32, %arg1: i32) -> (i32, i32, i32) {
    %c0_i32 = arith.constant 0 : i32
    %c0_i32_0 = arith.constant 0 : i32
    return %arg0, %arg1, %c0_i32 : i32, i32, i32
  }
  func.func @transform_7(%arg0: i32, %arg1: i32) -> (i32, i32, i32) {
    %c0_i32 = arith.constant 0 : i32
    %c0_i32_0 = arith.constant 0 : i32
    return %arg0, %arg1, %c0_i32 : i32, i32, i32
  }
  func.func @transform_8(%arg0: i32, %arg1: i32) -> (i32, i32, i32, i32) {
    %c0_i32 = arith.constant 0 : i32
    %c0_i32_0 = arith.constant 0 : i32
    %c0_i32_1 = arith.constant 0 : i32
    return %arg0, %arg1, %c0_i32, %c0_i32_0 : i32, i32, i32, i32
  }
}

</mosaic_0001>

<bundles_post_ra>
// kernel: tpu_custom_call.1
= control target key start
LH: loop header
LB: loop body
LE: loop exit
PB: predicated region body
PF: predicated region fallthrough
CT: control target
= control target key end

     0   :  { %s3234_s0 = inlined_call_operand.vmem [shape: s32[2], index: 0, kind: input, shape index: {}]   ;;  %s3235_s1 = inlined_call_operand.vmem [shape: bf16[2,36,128], index: 1, kind: input, shape index: {}]   ;;  %s3236_s2 = inlined_call_operand.hbm [shape: bf16[5,128,128], index: 2, kind: input, shape index: {}]   ;;  %s3237_s3 = inlined_call_operand.vmem [shape: f32[1,128], index: 3, kind: input, shape index: {}]   ;;  %s3238_s4 = inlined_call_operand.hbm [shape: bf16[5,128,128], index: 4, kind: input, shape index: {}]   ;;  %s3239_s5 = inlined_call_operand.vmem [shape: f32[1,128], index: 5, kind: input, shape index: {}]   ;;  %s3240_s6 = inlined_call_operand.hbm [shape: bf16[2,32,128], index: 6, kind: output, shape index: {0}]   ;;  %s3241_s7 = inlined_call_operand.hbm [shape: bf16[2,32,128], index: 7, kind: output, shape index: {1}]   ;;  %s3242_s8 = inlined_call_operand.hbm [shape: f32[2,1,1,128], index: 8, kind: output, shape index: {2}]  }
   0x1   :  { %3251 = sst [smem:[#allocation18_spill]] %s3234_s0 }
   0x2   :  { %3252 = sst [smem:[#allocation19_spill]] %s3235_s1 }
   0x3   :  { %14 = vsyncpa [#allocation5], 0 }
   0x4   :  { %15 = vsyncpa [#allocation3], 0 }
   0x5   :  { %16 = vsyncpa [#allocation8], 0 }
   0x6   :  { %17 = vsyncpa [#allocation4], 0 }
   0x7   :  { %19 = vsyncpa [#allocation4 + $0x1], 0 }
   0x8   :  { %20 = vsyncpa [#allocation11], 0 }
   0x9   :  { %22 = vsyncpa [#allocation11 + $0x1], 0  ;;  %s2909_s27 = smov 0   ;;  %s2911_s28 = smov 0  }
   0xa   :  { %s2913_s29 = smov 0   ;;  %s2915_s30 = smov 0  }
   0xb   :  { %s2917_s9 = smov 0   ;;  %s2919_s10 = smov 0  }
   0xc LB: > { %s2940_s11 = sadd.s32 4294967295, %s2851_s10   ;;  %s3246_s12 = sadd.s32 4294967294, %s2851_s10   ;;  %s2851_s10 = sphi %s2919_s10, %s28_s10   ;;  %s2847_s9 = sphi %s2917_s9, %s3277_s9   ;;  %s2843_s30 = sphi %s2915_s30, %s3276_s30   ;;  %s2839_s29 = sphi %s2913_s29, %s3275_s29   ;;  %s2835_s28 = sphi %s2911_s28, %s3274_s28   ;;  %s2831_s27 = sphi %s2909_s27, %s3273_s27  }
   0xd   : > { %s40_s13 = sadd.s32 1, %s2847_s9  ;;  %s180_s14 = sadd.s32 1, %s2839_s29 }
   0xe   : > { %p42_p0 = scmp.ge.s32.totalorder %s40_s13, 2  ;;  %p190_p1 = scmp.ne.s32.totalorder %s2839_s29, %s2835_s28 }
   0xf   : > { %p191_p2 = scmp.eq.s32.totalorder %s2940_s11, 1  ;;  %p196_p3 = scmp.ne.s32.totalorder %s2835_s28, %s2831_s27 }
  0x10   : > { %s3279_s13 = smov (%p42_p0, %s40_s13), 0  ;;  %p197_p5 = scmp.eq.s32.totalorder %s3246_s12, 1 }
  0x11   : > { %p2952_p4 = por %p191_p2, %p190_p1  ;;  %s175_s16 = ssub.s32 %s2847_s9, %s3279_s13 }
  0x12   : > { %p1985_p6 = scmp.ge.s32.totalorder %s2851_s10, 1  ;;  %p178_p7 = scmp.eq.s32.totalorder %s175_s16, 0 }
  0x13   : > { %s3253_s15 = scalar_select %p2952_p4, 1, 0 }
  0x14   : > { %p2961_p8 = por %p197_p5, %p196_p3  ;;  %p260_p9 = scmp.lt.s32.totalorder %s2851_s10, 3 }
  0x15   : > { %s2967_s18 = scalar_select %p178_p7, %s2839_s29, %s180_s14  }
  0x16   : > { %s3254_s17 = scalar_select %p2961_p8, 1, 0 }
  0x17   : > { %p2969_p10 = pnand %p1985_p6, %p260_p9  ;;  %p3243_p11 = scmp.eq.s32.totalorder %s2940_s11, 0 }
  0x18   : > { %s3256_s0 = sld [smem:[#allocation18_spill]]  ;;  %s2853_s24 = smov [#allocation6]  }
  0x19   : > { %s3255_s19 = scalar_select %p2969_p10, 1, 0 }
  0x1a   : > { %p2458_p12 = pneg %p2969_p10  ;;  %s283_s25 = sshll.u32 %s2853_s24, 4  ;;  %s284_s25 = int_to_ptr.vmem [resolvable:$true] %s283_s25 }
  0x1c   : > { %p2981_p13 = pnand %p3243_p11, %p2458_p12 }
  0x1e   : > { %s273_s22 = sshll.u32 %s3256_s0, 4  ;;  %p2642_p1 = pneg %p2981_p13  ;;  %s274_s22 = int_to_ptr.vmem [resolvable:$true] %s273_s22 }
  0x1f   : > { %s2640_s26 = scalar_lea.vmem %s274_s22, 16  ;;  %p2648_p5 = scmp.lt.s32.totalorder %s274_s22, %s274_s22 }
  0x20   : > { %p2641_p0 = scmp.ne.s32.totalorder %s274_s22, %s2640_s26  ;;  %p2649_p6 = scmp.lt.s32.totalorder %s2640_s26, %s2640_s26 }
  0x22   : > { %p2643_p2 = pnand %p2642_p1, %p2641_p0  ;;  %p2650_p7 = por %p2649_p6, %p2648_p5 }
  0x24   : > { %p2644_p3 = pneg %p2643_p2 }
  0x26   : > { %p2651_p9 = pnand %p2650_p7, %p2644_p3 }
  0x28   : > { %2654 = shalt.err (!%p2651_p9)
}
  0x29   : > { %s2854_s14 = smov [#allocation2]   ;;  %s2666_s16 = scalar_lea.vmem %s284_s25, 5120 }
  0x2a   : > { %2461 = dma.vmem_to_smem (!%p2981_p13), %s274_s22, 16, %s2854_s14, [#allocation5]  }
  0x2b   : > { %p2667_p12 = scmp.ne.s32.totalorder %s284_s25, %s2666_s16  ;;  %p2674_p4 = scmp.lt.s32.totalorder %s284_s25, %s284_s25 }
  0x2c   : > { %p2675_p10 = scmp.lt.s32.totalorder %s2666_s16, %s2666_s16 }
  0x2d   : > { %p2669_p11 = pnand %p2667_p12, %p2642_p1 }
  0x2e   : > { %p2676_p0 = por %p2675_p10, %p2674_p4 }
  0x2f   : > { %p2670_p8 = pneg %p2669_p11 }
  0x31   : > { %p2677_p2 = pnand %p2676_p0, %p2670_p8 }
  0x33   : > { %2680 = shalt.err (!%p2677_p2)
}
  0x34   : > { %s2855_s20 = smov 64   ;;  %s2856_s21 = smov 4  }
  0x35   : > { %2464 = dma.hbm_to_vmem [thread:$0]  (!%p2981_p13), %s3236_s2, 5120, %s284_s25, [#allocation3], %s2855_s20, %s2855_s20, %s2856_s21  }
  0x36   : > { %s2857_s22 = smov [#allocation7]  }
  0x37   : > { %s299_s14 = sshll.u32 %s2857_s22, 4  ;;  %s300_s14 = int_to_ptr.vmem [resolvable:$true] %s299_s14 }
  0x38   : > { %s2692_s12 = scalar_lea.vmem %s300_s14, 5120  ;;  %p2700_p8 = scmp.lt.s32.totalorder %s300_s14, %s300_s14 }
  0x39   : > { %p2693_p3 = scmp.ne.s32.totalorder %s300_s14, %s2692_s12  ;;  %p2701_p10 = scmp.lt.s32.totalorder %s2692_s12, %s2692_s12 }
  0x3b   : > { %p2695_p11 = pnand %p2693_p3, %p2642_p1  ;;  %p2702_p5 = por %p2701_p10, %p2700_p8 }
  0x3d   : > { %p2696_p4 = pneg %p2695_p11 }
  0x3f   : > { %p2703_p6 = pnand %p2702_p5, %p2696_p4 }
  0x41   : > { %2706 = shalt.err (!%p2703_p6)
}
  0x42   : > { %2467 = dma.hbm_to_vmem [thread:$0]  (!%p2981_p13), %s3238_s4, 5120, %s300_s14, [#allocation8], %s2855_s20, %s2855_s20, %s2856_s21  }
  0x43   : > { %p3258_p7 = scmp.ne.s32.totalorder %s3255_s19, 0 }
  0x44   : > { %p3259_p9 = scmp.eq.s32.totalorder (!%p3258_p7), %s2940_s11, 0 }
  0x45   : > { %326 = sbr.rel (%p3258_p7) target bundleno = 528 (0x210), region = 44 }
  0x4a   : > { %2810 = dma.done.wait (%p3259_p9), [#allocation5], 16   ;;  %p3260_p1 = pmov %p3259_p9 }
  0x4c   : > { %2812 = vsyncadd (%p3260_p1), [#allocation5], 4294967280  ;;  %p3261_p12 = pmov %p3260_p1 }
  0x4d   : > { %p3262_p0 = pmov %p3260_p1 }
  0x4e   : > { %2814 = dma.done.wait (%p3261_p12), [#allocation3], 5120  }
  0x4f   : > { %2816 = vsyncadd (%p3262_p0), [#allocation3], 4294962176  ;;  %p3263_p2 = pmov %p3262_p0 }
  0x50   : > { %p3264_p13 = pmov %p3262_p0 }
  0x51   : > { %2818 = dma.done.wait (%p3263_p2), [#allocation8], 5120  }
  0x52   : > { %2820 = vsyncadd (%p3264_p13), [#allocation8], 4294962176 }
  0x53   : > { %340 = sfence }
  0x54   : > { %v2541_v0 = vld [vmem:[#allocation6 + $0x78] sm:$0xff]   ;;  %v2543_v2 = vld [vmem:[#allocation6 + $0x70] sm:$0xff]   ;;  %p378_p3 = scmp.lt.s32.totalorder %s2843_s30, 1  ;;  %v2545_v4 = vld [vmem:[#allocation6 + $0x68] sm:$0xff]   ;;  %s3265_s1 = sld [smem:[#allocation19_spill]]  ;;  %vm1401_vm1 = vcmask 1045504  }
  0x55   : > { %v2542_v1 = vld [vmem:[#allocation6 + $0x38] sm:$0xff]   ;;  %2239 = vmatprep.subr.bf16.mxu0 %v2541_v0  ;;  %v2544_v3 = vld [vmem:[#allocation6 + $0x30] sm:$0xff]   ;;  %v2546_v5 = vld [vmem:[#allocation6 + $0x28] sm:$0xff]   ;;  %vm458_vm0 = vsmask.f32 7424  ;;  %vm905_vm2 = vcmask 1046528  }
  0x56   : > { %2259 = vmatprep.subr.bf16.mxu1 %v2542_v1  ;;  %2240 = vmatpush3.bf16.msra.mxu0 %v2541_v0  ;;  %s379_s0 = scalar_select %p378_p3, %s2843_s30, 1  ;;  %v2547_v6 = vld [vmem:[#allocation6 + $0x60] sm:$0xff]   ;;  %v2549_v8 = vld [vmem:[#allocation6 + $0x58] sm:$0xff]   ;;  %v2551_v10 = vld [vmem:[#allocation6 + $0x50] sm:$0xff]   ;;  %vm1149_vm3 = vsmask.f32 6400 }
  0x57   : > { %2260 = vmatpush3.bf16.msra.mxu1 %v2542_v1  ;;  %2241 = vmatprep.subr.bf16.mxu0 %v2543_v2  ;;  %v2548_v7 = vld [vmem:[#allocation6 + $0x20] sm:$0xff]   ;;  %v2550_v9 = vld [vmem:[#allocation6 + $0x18] sm:$0xff]   ;;  %v2552_v11 = vld [vmem:[#allocation6 + $0x10] sm:$0xff]   ;;  %s3095_s24 = sand.u32 1, %s2835_s28   ;;  %s3248_s19 = sshll.u32 %s2843_s30, 8 }
  0x58   : > { %2261 = vmatprep.subr.bf16.mxu1 %v2544_v3  ;;  %s2439_s12 = smul.u32 20, %s379_s0  ;;  %v2553_v15 = vld [vmem:[#allocation6 + $0x48] sm:$0xff]   ;;  %v2555_v25 = vld [vmem:[#allocation6 + $0x40] sm:$0xff]   ;;  %v2560_v32 = vld [vmem:[#allocation7 + $0x78] sm:$0xff]   ;;  %s3247_s26 = sshll.u32 %s3095_s24, 4 }
  0x59   : > { %v2554_v19 = vld [vmem:[#allocation6 + $0x8] sm:$0xff]   ;;  %v2556_v26 = vld [vmem:[#allocation6] sm:$0xff]   ;;  %v2561_v34 = vld [vmem:[#allocation7 + $0x38] sm:$0xff]   ;;  %s371_s16 = scalar_lea.vmem [#allocation10], %s3247_s26  ;;  %p3266_p4 = scmp.ne.s32.totalorder %s3253_s15, 0 }
  0x5a   : > { %2242 = vmatpush3.bf16.msra.mxu0 %v2543_v2  ;;  %s382_s25 = scalar_lea.vmem %s3265_s1, %s2439_s12  ;;  %v2562_v41 = vld [vmem:[#allocation7 + $0x70] sm:$0xff]   ;;  %v2564_v47 = vld [vmem:[#allocation7 + $0x68] sm:$0xff]   ;;  %v2566_v52 = vld [vmem:[#allocation7 + $0x60] sm:$0xff]   ;;  %s1799_s0 = sshll.u32 %s371_s16, 4  ;;  %s3116_s0 = int_to_ptr.vmem [resolvable:$true] %s1799_s0 }
  0x5b   : > { %2262 = vmatpush3.bf16.msra.mxu1 %v2544_v3  ;;  %2243 = vmatprep.subr.bf16.mxu0 %v2545_v4  ;;  %v3027_v12 = vld [vmem:[%s382_s25] sm:$0xff]   ;;  %v3029_v13 = vld [vmem:[%s382_s25 + $0x8] sm:$0xff]   ;;  %v3031_v14 = vld [vmem:[%s382_s25 + $0x10] ss:$0 sps:$4 sm:$0x33]   ;;  %s1761_s12 = sand.u32 1, %s2940_s11   ;;  %s3124_s25 = scalar_lea.hbm %s3241_s7, %s3248_s19 }
  0x5c   : > { %2263 = vmatprep.subr.bf16.mxu1 %v2546_v5  ;;  %v460_v16 = vshrl.u32 %v3027_v12, 16  ;;  %v462_v17 = vshll.u32 %v3027_v12, 16  ;;  %v467_v18 = vshll.u32 %v3029_v13, 16  ;;  %2275 = vmatprep.mubr.bf16.mxu1 %v3027_v12  ;;  %v471_v23 = vshrl.u32 %v3029_v13, 16  ;;  %v2563_v43 = vld [vmem:[#allocation7 + $0x30] sm:$0xff]   ;;  %v2565_v49 = vld [vmem:[#allocation7 + $0x28] sm:$0xff]  }
  0x5d   : > { %v475_v24 = vshll.u32 %v3031_v14, 16  ;;  %v1157_v37 = vshrl.u32 %v3031_v14, 16  ;;  %v1402_v45 = vrot.slane %v3027_v12, 2  ;;  %v1403_v46 = vrot.slane %v3029_v13, 2  ;;  %v2567_v53 = vld [vmem:[#allocation7 + $0x20] sm:$0xff]   ;;  %v2568_v54 = vld [vmem:[#allocation7 + $0x58] sm:$0xff]  }
  0x5e   : > { %2244 = vmatpush3.bf16.msra.mxu0 %v2545_v4  ;;  %v464_v20 = vrot.slane %v462_v17, 1  ;;  %v469_v21 = vrot.slane %v467_v18, 1  ;;  %v3040_v28 = vrot.slane %v460_v16, 1  ;;  %v3042_v31 = vrot.slane %v462_v17, 2  ;;  %v2569_v55 = vld [vmem:[#allocation7 + $0x18] sm:$0xff]   ;;  %v2570_v56 = vld [vmem:[#allocation7 + $0x50] sm:$0xff]  }
  0x5f   : > { %2264 = vmatpush3.bf16.msra.mxu1 %v2546_v5  ;;  %2245 = vmatprep.subr.bf16.mxu0 %v2547_v6  ;;  %v477_v30 = vrot.slane %v475_v24, 1  ;;  %v1153_v33 = vrot.slane %v471_v23, 1  ;;  %v1154_v36 = vrot.slane %v467_v18, 2  ;;  %v3052_v40 = vrot.slane %v475_v24, 2  ;;  %v2571_v57 = vld [vmem:[#allocation7 + $0x10] sm:$0xff]   ;;  %v2572_v58 = vld [vmem:[#allocation7 + $0x48] sm:$0xff]  }
  0x60   : > { %2265 = vmatprep.subr.bf16.mxu1 %v2548_v7  ;;  %v465_v22 = vor.u32 %v464_v20, %v460_v16  ;;  %v473_v29 = vor.u32 %v471_v23, %v469_v21  ;;  %v1152_v35 = vor.u32 %v3042_v31, %v3040_v28  ;;  %v3054_v42 = vrot.slane %v1157_v37, 1  ;;  %v2573_v59 = vld [vmem:[#allocation7 + $0x8] sm:$0xff]   ;;  %v2574_v60 = vld [vmem:[#allocation7 + $0x40] sm:$0xff]   ;;  %v2576_v62 = vld [vmem:[#allocation6 + $0xb8] sm:$0xff]   ;;  %s3126_s20 = scalar_lea.sflag [#allocation11], %s1761_s12  ;;  %s2707_s21 = scalar_lea.vmem %s3116_s0, 256 }
  0x61   : > { %v3050_v39 = vor.u32 %v1154_v36, %v1153_v33  ;;  %v1405_v48 = vrot.slane %v3031_v14, 2  ;;  %v3063_v50 = vsel %vm1401_vm1, %v1402_v45, %v1403_v46  ;;  %v2575_v61 = vld [vmem:[#allocation7] sm:$0xff]   ;;  %v2577_v63 = vld [vmem:[#allocation7 + $0xb8] sm:$0xff]   ;;  %v906_v0 = vrot.slane %v3027_v12, 1  ;;  %v2578_v2 = vld [vmem:[#allocation6 + $0xb0] sm:$0xff]   ;;  %p2708_p11 = scmp.ne.s32.totalorder %s3116_s0, %s2707_s21  ;;  %s2858_s22 = smov [#allocation10]  }
  0x62   : > { %2246 = vmatpush3.bf16.msra.mxu0 %v2547_v6  ;;  %v470_v27 = vsel %vm458_vm0, %v465_v22, %v469_v21  ;;  %v3048_v38 = vsel %vm458_vm0, %v473_v29, %v477_v30  ;;  %v1161_v44 = vor.u32 %v3052_v40, %v3054_v42  ;;  %v907_v1 = vrot.slane %v3029_v13, 1  ;;  %v2579_v3 = vld [vmem:[#allocation7 + $0xb0] sm:$0xff]   ;;  %v2580_v5 = vld [vmem:[#allocation6 + $0xa8] sm:$0xff]   ;;  %v2590_v18 = vld [vmem:[#allocation6 + $0x80] sm:$0xff]   ;;  %s2711_s14 = sshll.u32 %s2858_s22, 4  ;;  %s2712_s14 = int_to_ptr.vmem [resolvable:$false] %s2711_s14 }
  0x63   : > { %2266 = vmatpush3.bf16.msra.mxu1 %v2548_v7  ;;  %2247 = vmatprep.subr.bf16.mxu0 %v2549_v8  ;;  %v3066_v51 = vsel %vm1401_vm1, %v1403_v46, %v1405_v48  ;;  %v1156_v6 = vsel %vm1149_vm3, %v1152_v35, %v3050_v39  ;;  %v2588_v16 = vld [vmem:[#allocation6 + $0x88] sm:$0xff]   ;;  %v909_v20 = vrot.slane %v3031_v14, 1  ;;  %v2592_v21 = vld [vmem:[#allocation6 + $0xf8] sm:$0xff]   ;;  %v2594_v24 = vld [vmem:[#allocation6 + $0xf0] sm:$0xff]   ;;  %p2709_p8 = pnand %p2708_p11, %p3266_p4  ;;  %s2713_s26 = scalar_lea.vmem %s2712_s14, 512 }
  0x64   : > { %2267 = vmatprep.subr.bf16.mxu1 %v2550_v9  ;;  %2255 = vmatprep.mubr.bf16.mxu0 %v470_v27  ;;  %v908_v4 = vsel %vm905_vm2, %v906_v0, %v907_v1  ;;  %v3081_v7 = vsel %vm1149_vm3, %v3050_v39, %v1161_v44  ;;  %v2589_v17 = vld [vmem:[#allocation7 + $0x88] sm:$0xff]   ;;  %v2593_v22 = vld [vmem:[#allocation7 + $0xf8] sm:$0xff]   ;;  %v2599_v28 = vld [vmem:[#allocation7 + $0xe0] sm:$0xff]   ;;  %p2714_p5 = scmp.lt.s32.totalorder %s3116_s0, %s2712_s14  ;;  %p2715_p6 = scmp.lt.s32.totalorder %s2713_s26, %s2707_s21 }
  0x65   : > { %v910_v23 = vsel %vm905_vm2, %v907_v1, %v909_v20  ;;  %v2597_v14 = vld [vmem:[#allocation7 + $0xe8] sm:$0xff]   ;;  %v2600_v29 = vld [vmem:[#allocation6 + $0xd8] sm:$0xff]   ;;  %v2602_v31 = vld [vmem:[#allocation6 + $0xd0] sm:$0xff]   ;;  %p2710_p10 = pneg %p2709_p8 }
  0x66   : > { %2248 = vmatpush3.bf16.msra.mxu0 %v2549_v8  ;;  %v2581_v8 = vld [vmem:[#allocation7 + $0xa8] sm:$0xff]   ;;  %v2601_v30 = vld [vmem:[#allocation7 + $0xd8] sm:$0xff]   ;;  %v2606_v35 = vld [vmem:[#allocation6 + $0xc0] sm:$0xff]   ;;  %p2716_p7 = por %p2715_p6, %p2714_p5 }
  0x67   : > { %2268 = vmatpush3.bf16.msra.mxu1 %v2550_v9  ;;  %2249 = vmatprep.subr.bf16.mxu0 %v2551_v10  ;;  %v2582_v9 = vld [vmem:[#allocation6 + $0xa0] sm:$0xff]   ;;  %v2604_v33 = vld [vmem:[#allocation6 + $0xc8] sm:$0xff]   ;;  %v2608_v37 = vld [vmem:[#allocation6 + $0x138] sm:$0xff]  }
  0x68   : > { %2269 = vmatprep.subr.bf16.mxu1 %v2552_v11  ;;  %v2607_v36 = vld [vmem:[#allocation7 + $0xc0] sm:$0xff]   ;;  %v2610_v39 = vld [vmem:[#allocation6 + $0x130] sm:$0xff]   ;;  %v2613_v42 = vld [vmem:[#allocation7 + $0x128] sm:$0xff]   ;;  %p2717_p9 = pnand %p2716_p7, %p2710_p10 }
  0x69   : > { %v2611_v40 = vld [vmem:[#allocation7 + $0x130] sm:$0xff]   ;;  %v2615_v44 = vld [vmem:[#allocation7 + $0x120] sm:$0xff]   ;;  %v2616_v45 = vld [vmem:[#allocation6 + $0x118] sm:$0xff]  }
  0x6a   : > { %2250 = vmatpush3.bf16.msra.mxu0 %v2551_v10  ;;  %v2583_v10 = vld [vmem:[#allocation7 + $0xa0] sm:$0xff]   ;;  %v2617_v46 = vld [vmem:[#allocation7 + $0x118] sm:$0xff]   ;;  %v2619_v48 = vld [vmem:[#allocation7 + $0x110] sm:$0xff]  }
  0x6b   : > { %2270 = vmatpush3.bf16.msra.mxu1 %v2552_v11  ;;  %2251 = vmatprep.subr.bf16.mxu0 %v2553_v15  ;;  %v2584_v11 = vld [vmem:[#allocation6 + $0x98] sm:$0xff]  }
  0x6c   : > { %2271 = vmatprep.subr.bf16.mxu1 %v2554_v19 }
  0x6e   : > { %2252 = vmatpush3.bf16.msra.mxu0 %v2553_v15  ;;  %v2587_v15 = vld [vmem:[#allocation7 + $0x90] sm:$0xff]  }
  0x6f   : > { %2272 = vmatpush3.bf16.msra.mxu1 %v2554_v19  ;;  %2253 = vmatprep.subr.bf16.mxu0 %v2555_v25  ;;  %v2591_v19 = vld [vmem:[#allocation7 + $0x80] sm:$0xff]  }
  0x70   : > { %2273 = vmatprep.subr.bf16.mxu1 %v2556_v26 }
  0x72   : > { %2254 = vmatpush3.bf16.msra.mxu0 %v2555_v25  ;;  %v2595_v25 = vld [vmem:[#allocation7 + $0xf0] sm:$0xff]  }
  0x73   : > { %2274 = vmatpush3.bf16.msra.mxu1 %v2556_v26  ;;  %2279 = vmatprep.subr.bf16.mxu0 %v2560_v32  ;;  %v2596_v26 = vld [vmem:[#allocation6 + $0xe8] sm:$0xff]  }
  0x74   : > { %2299 = vmatprep.subr.bf16.mxu1 %v2561_v34 }
  0x75   : > { %2256 = vmatmul.mubr.bf16.vlgmr.msra.gmra.mxu0 %v3048_v38 }
  0x76   : > { %2276 = vmatmul.mubr.bf16.vlgmr.msra.gmra.mxu1 %v3029_v13  ;;  %2280 = vmatpush3.bf16.msra.mxu0 %v2560_v32  ;;  %v2603_v32 = vld [vmem:[#allocation7 + $0xd0] sm:$0xff]  }
  0x77   : > { %2300 = vmatpush3.bf16.msra.mxu1 %v2561_v34  ;;  %2281 = vmatprep.subr.bf16.mxu0 %v2562_v41  ;;  %v2605_v34 = vld [vmem:[#allocation7 + $0xc8] sm:$0xff]  }
  0x78   : > { %2301 = vmatprep.subr.bf16.mxu1 %v2563_v43  ;;  %2295 = vmatprep.mubr.bf16.mxu0 %v470_v27  ;;  %v2598_v27 = vld [vmem:[#allocation6 + $0xe0] sm:$0xff]  }
  0x79   : > { %2315 = vmatprep.mubr.bf16.mxu1 %v3027_v12  ;;  %v2585_v12 = vld [vmem:[#allocation7 + $0x98] sm:$0xff]  }
  0x7a   : > { %2282 = vmatpush3.bf16.msra.mxu0 %v2562_v41  ;;  %v2612_v41 = vld [vmem:[#allocation6 + $0x128] sm:$0xff]  }
  0x7b   : > { %2302 = vmatpush3.bf16.msra.mxu1 %v2563_v43  ;;  %2283 = vmatprep.subr.bf16.mxu0 %v2564_v47  ;;  %v2614_v43 = vld [vmem:[#allocation6 + $0x120] sm:$0xff]  }
  0x7c   : > { %2303 = vmatprep.subr.bf16.mxu1 %v2565_v49 }
  0x7e   : > { %2284 = vmatpush3.bf16.msra.mxu0 %v2564_v47  ;;  %v2618_v47 = vld [vmem:[#allocation6 + $0x110] sm:$0xff]  }
  0x7f   : > { %2304 = vmatpush3.bf16.msra.mxu1 %v2565_v49  ;;  %2285 = vmatprep.subr.bf16.mxu0 %v2566_v52  ;;  %v2620_v49 = vld [vmem:[#allocation6 + $0x108] sm:$0xff]  }
  0x80   : > { %2305 = vmatprep.subr.bf16.mxu1 %v2567_v53 }
  0x82   : > { %2286 = vmatpush3.bf16.msra.mxu0 %v2566_v52  ;;  %v2622_v52 = vld [vmem:[#allocation6 + $0x100] sm:$0xff]  }
  0x83   : > { %2306 = vmatpush3.bf16.msra.mxu1 %v2567_v53  ;;  %2287 = vmatprep.subr.bf16.mxu0 %v2568_v54  ;;  %v2623_v53 = vld [vmem:[#allocation7 + $0x100] sm:$0xff]  }
  0x84   : > { %2307 = vmatprep.subr.bf16.mxu1 %v2569_v55 }
  0x86   : > { %2288 = vmatpush3.bf16.msra.mxu0 %v2568_v54 }
  0x87   : > { %2308 = vmatpush3.bf16.msra.mxu1 %v2569_v55  ;;  %2289 = vmatprep.subr.bf16.mxu0 %v2570_v56 }
  0x88   : > { %2309 = vmatprep.subr.bf16.mxu1 %v2571_v57 }
  0x8a   : > { %2290 = vmatpush3.bf16.msra.mxu0 %v2570_v56 }
  0x8b   : > { %2310 = vmatpush3.bf16.msra.mxu1 %v2571_v57  ;;  %2291 = vmatprep.subr.bf16.mxu0 %v2572_v58 }
  0x8c   : > { %2311 = vmatprep.subr.bf16.mxu1 %v2573_v59 }
  0x8e   : > { %2292 = vmatpush3.bf16.msra.mxu0 %v2572_v58 }
  0x8f   : > { %2312 = vmatpush3.bf16.msra.mxu1 %v2573_v59  ;;  %2293 = vmatprep.subr.bf16.mxu0 %v2574_v60 }
  0x90   : > { %2313 = vmatprep.subr.bf16.mxu1 %v2575_v61 }
  0x92   : > { %2294 = vmatpush3.bf16.msra.mxu0 %v2574_v60 }
  0x93   : > { %2314 = vmatpush3.bf16.msra.mxu1 %v2575_v61  ;;  %2319 = vmatprep.subr.bf16.mxu0 %v2576_v62 }
  0x94   : > { %2339 = vmatprep.subr.bf16.mxu1 %v2577_v63 }
  0x95   : > { %2296 = vmatmul.mubr.bf16.vlgmr.msra.gmra.mxu0 %v3048_v38  ;;  %v2609_v38 = vld [vmem:[#allocation7 + $0x138] sm:$0xff]  }
  0x96   : > { %2316 = vmatmul.mubr.bf16.vlgmr.msra.gmra.mxu1 %v3029_v13  ;;  %2320 = vmatpush3.bf16.msra.mxu0 %v2576_v62  ;;  %v2586_v13 = vld [vmem:[#allocation6 + $0x90] sm:$0xff]  }
  0x97   : > { %2340 = vmatpush3.bf16.msra.mxu1 %v2577_v63  ;;  %2321 = vmatprep.subr.bf16.mxu0 %v2578_v2 }
  0x98   : > { %2341 = vmatprep.subr.bf16.mxu1 %v2579_v3  ;;  %2335 = vmatprep.mubr.bf16.mxu0 %v908_v4 }
  0x99   : > { %2355 = vmatprep.mubr.bf16.mxu1 %v908_v4 }
  0x9a   : > { %2322 = vmatpush3.bf16.msra.mxu0 %v2578_v2 }
  0x9b   : > { %2342 = vmatpush3.bf16.msra.mxu1 %v2579_v3  ;;  %2323 = vmatprep.subr.bf16.mxu0 %v2580_v5 }
  0x9c   : > { %2343 = vmatprep.subr.bf16.mxu1 %v2581_v8 }
  0x9e   : > { %2324 = vmatpush3.bf16.msra.mxu0 %v2580_v5 }
  0x9f   : > { %2344 = vmatpush3.bf16.msra.mxu1 %v2581_v8  ;;  %2325 = vmatprep.subr.bf16.mxu0 %v2582_v9 }
  0xa0   : > { %2345 = vmatprep.subr.bf16.mxu1 %v2583_v10 }
  0xa2   : > { %2326 = vmatpush3.bf16.msra.mxu0 %v2582_v9 }
  0xa3   : > { %2346 = vmatpush3.bf16.msra.mxu1 %v2583_v10  ;;  %2327 = vmatprep.subr.bf16.mxu0 %v2584_v11 }
  0xa4   : > { %2347 = vmatprep.subr.bf16.mxu1 %v2585_v12 }
  0xa6   : > { %2328 = vmatpush3.bf16.msra.mxu0 %v2584_v11 }
  0xa7   : > { %2348 = vmatpush3.bf16.msra.mxu1 %v2585_v12  ;;  %2329 = vmatprep.subr.bf16.mxu0 %v2586_v13 }
  0xa8   : > { %2349 = vmatprep.subr.bf16.mxu1 %v2587_v15 }
  0xaa   : > { %2330 = vmatpush3.bf16.msra.mxu0 %v2586_v13 }
  0xab   : > { %2350 = vmatpush3.bf16.msra.mxu1 %v2587_v15  ;;  %2331 = vmatprep.subr.bf16.mxu0 %v2588_v16 }
  0xac   : > { %2351 = vmatprep.subr.bf16.mxu1 %v2589_v17 }
  0xae   : > { %2332 = vmatpush3.bf16.msra.mxu0 %v2588_v16 }
  0xaf   : > { %2352 = vmatpush3.bf16.msra.mxu1 %v2589_v17  ;;  %2333 = vmatprep.subr.bf16.mxu0 %v2590_v18 }
  0xb0   : > { %2353 = vmatprep.subr.bf16.mxu1 %v2591_v19 }
  0xb2   : > { %2334 = vmatpush3.bf16.msra.mxu0 %v2590_v18 }
  0xb3   : > { %2354 = vmatpush3.bf16.msra.mxu1 %v2591_v19  ;;  %2359 = vmatprep.subr.bf16.mxu0 %v2592_v21 }
  0xb4   : > { %2379 = vmatprep.subr.bf16.mxu1 %v2593_v22 }
  0xb5   : > { %2336 = vmatmul.mubr.bf16.vlgmr.msra.gmra.mxu0 %v910_v23 }
  0xb6   : > { %2356 = vmatmul.mubr.bf16.vlgmr.msra.gmra.mxu1 %v910_v23  ;;  %2360 = vmatpush3.bf16.msra.mxu0 %v2592_v21 }
  0xb7   : > { %2380 = vmatpush3.bf16.msra.mxu1 %v2593_v22  ;;  %2361 = vmatprep.subr.bf16.mxu0 %v2594_v24 }
  0xb8   : > { %2381 = vmatprep.subr.bf16.mxu1 %v2595_v25  ;;  %2375 = vmatprep.mubr.bf16.mxu0 %v1156_v6 }
  0xb9   : > { %2395 = vmatprep.mubr.bf16.mxu1 %v1156_v6 }
  0xba   : > { %2362 = vmatpush3.bf16.msra.mxu0 %v2594_v24 }
  0xbb   : > { %2382 = vmatpush3.bf16.msra.mxu1 %v2595_v25  ;;  %2363 = vmatprep.subr.bf16.mxu0 %v2596_v26 }
  0xbc   : > { %2383 = vmatprep.subr.bf16.mxu1 %v2597_v14 }
  0xbe   : > { %2364 = vmatpush3.bf16.msra.mxu0 %v2596_v26 }
  0xbf   : > { %2384 = vmatpush3.bf16.msra.mxu1 %v2597_v14  ;;  %2365 = vmatprep.subr.bf16.mxu0 %v2598_v27 }
  0xc0   : > { %2385 = vmatprep.subr.bf16.mxu1 %v2599_v28 }
  0xc2   : > { %2366 = vmatpush3.bf16.msra.mxu0 %v2598_v27 }
  0xc3   : > { %2386 = vmatpush3.bf16.msra.mxu1 %v2599_v28  ;;  %2367 = vmatprep.subr.bf16.mxu0 %v2600_v29 }
  0xc4   : > { %2387 = vmatprep.subr.bf16.mxu1 %v2601_v30 }
  0xc6   : > { %2368 = vmatpush3.bf16.msra.mxu0 %v2600_v29 }
  0xc7   : > { %2388 = vmatpush3.bf16.msra.mxu1 %v2601_v30  ;;  %2369 = vmatprep.subr.bf16.mxu0 %v2602_v31 }
  0xc8   : > { %2389 = vmatprep.subr.bf16.mxu1 %v2603_v32 }
  0xca   : > { %2370 = vmatpush3.bf16.msra.mxu0 %v2602_v31 }
  0xcb   : > { %2390 = vmatpush3.bf16.msra.mxu1 %v2603_v32  ;;  %2371 = vmatprep.subr.bf16.mxu0 %v2604_v33  ;;  %v2080_v32 = vld [vmem:[%s3237_s3] ss:$0 sm:$0xff] }
  0xcc   : > { %2391 = vmatprep.subr.bf16.mxu1 %v2605_v34 }
  0xce   : > { %2372 = vmatpush3.bf16.msra.mxu0 %v2604_v33 }
  0xcf   : > { %2392 = vmatpush3.bf16.msra.mxu1 %v2605_v34  ;;  %2373 = vmatprep.subr.bf16.mxu0 %v2606_v35 }
  0xd0   : > { %2393 = vmatprep.subr.bf16.mxu1 %v2607_v36 }
  0xd2   : > { %2374 = vmatpush3.bf16.msra.mxu0 %v2606_v35 }
  0xd3   : > { %2394 = vmatpush3.bf16.msra.mxu1 %v2607_v36  ;;  %2399 = vmatprep.subr.bf16.mxu0 %v2608_v37 }
  0xd4   : > { %2419 = vmatprep.subr.bf16.mxu1 %v2609_v38 }
  0xd5   : > { %2376 = vmatmul.mubr.bf16.vlgmr.msra.gmra.mxu0 %v3081_v7 }
  0xd6   : > { %2396 = vmatmul.mubr.bf16.vlgmr.msra.gmra.mxu1 %v3081_v7  ;;  %2400 = vmatpush3.bf16.msra.mxu0 %v2608_v37 }
  0xd7   : > { %2420 = vmatpush3.bf16.msra.mxu1 %v2609_v38  ;;  %2401 = vmatprep.subr.bf16.mxu0 %v2610_v39 }
  0xd8   : > { %2421 = vmatprep.subr.bf16.mxu1 %v2611_v40  ;;  %2415 = vmatprep.mubr.bf16.mxu0 %v3063_v50 }
  0xd9   : > { %2435 = vmatprep.mubr.bf16.mxu1 %v3063_v50  ;;  %v2621_v50 = vld [vmem:[#allocation7 + $0x108] sm:$0xff]  }
  0xda   : > { %2402 = vmatpush3.bf16.msra.mxu0 %v2610_v39 }
  0xdb   : > { %2422 = vmatpush3.bf16.msra.mxu1 %v2611_v40  ;;  %2403 = vmatprep.subr.bf16.mxu0 %v2612_v41 }
  0xdc   : > { %2423 = vmatprep.subr.bf16.mxu1 %v2613_v42 }
  0xde   : > { %2404 = vmatpush3.bf16.msra.mxu0 %v2612_v41 }
  0xdf   : > { %2424 = vmatpush3.bf16.msra.mxu1 %v2613_v42  ;;  %2405 = vmatprep.subr.bf16.mxu0 %v2614_v43 }
  0xe0   : > { %2425 = vmatprep.subr.bf16.mxu1 %v2615_v44 }
  0xe2   : > { %2406 = vmatpush3.bf16.msra.mxu0 %v2614_v43 }
  0xe3   : > { %2426 = vmatpush3.bf16.msra.mxu1 %v2615_v44  ;;  %2407 = vmatprep.subr.bf16.mxu0 %v2616_v45 }
  0xe4   : > { %2427 = vmatprep.subr.bf16.mxu1 %v2617_v46 }
  0xe6   : > { %2408 = vmatpush3.bf16.msra.mxu0 %v2616_v45 }
  0xe7   : > { %2428 = vmatpush3.bf16.msra.mxu1 %v2617_v46  ;;  %2409 = vmatprep.subr.bf16.mxu0 %v2618_v47 }
  0xe8   : > { %2429 = vmatprep.subr.bf16.mxu1 %v2619_v48 }
  0xea   : > { %2410 = vmatpush3.bf16.msra.mxu0 %v2618_v47 }
  0xeb   : > { %2430 = vmatpush3.bf16.msra.mxu1 %v2619_v48  ;;  %2411 = vmatprep.subr.bf16.mxu0 %v2620_v49 }
  0xec   : > { %2431 = vmatprep.subr.bf16.mxu1 %v2621_v50 }
  0xee   : > { %2412 = vmatpush3.bf16.msra.mxu0 %v2620_v49 }
  0xef   : > { %2432 = vmatpush3.bf16.msra.mxu1 %v2621_v50  ;;  %2413 = vmatprep.subr.bf16.mxu0 %v2622_v52 }
  0xf0   : > { %2433 = vmatprep.subr.bf16.mxu1 %v2623_v53 }
  0xf2   : > { %2414 = vmatpush3.bf16.msra.mxu0 %v2622_v52 }
  0xf3   : > { %2434 = vmatpush3.bf16.msra.mxu1 %v2623_v53 }
  0xf5   : > { %2416 = vmatmul.mubr.bf16.vlgmr.msra.gmra.mxu0 %v3066_v51 }
  0xf6   : > { %2436 = vmatmul.mubr.bf16.vlgmr.msra.gmra.mxu1 %v3066_v51 }
 0x135   : > { %v2257_v54 = vpop.f32.mrf.mxu0 }
 0x136   : > { %v2277_v55 = vpop.f32.mrf.mxu1 }
 0x137   : > { %v563_v56 = vpop.f32.mrf.mxu0  ;;  %v671_v19 = vadd.f32 %v2277_v55, %v2257_v54 }
 0x138   : > { %v662_v57 = vpop.f32.mrf.mxu1 }
 0x139   : > { %v2258_v58 = vpop.f32.mrf.mxu0  ;;  %v663_v21 = vadd.f32 %v662_v57, %v563_v56  ;;  %v2085_v56 = vld [vmem:[%s3239_s5] ss:$0 sm:$0xff] }
 0x13a   : > { %v2278_v59 = vpop.f32.mrf.mxu1 }
 0x13b   : > { %v566_v60 = vpop.f32.mrf.mxu0  ;;  %v674_v25 = vadd.f32 %v2278_v59, %v2258_v58 }
 0x13c   : > { %v665_v61 = vpop.f32.mrf.mxu1 }
 0x13d   : > { %v666_v33 = vadd.f32 %v665_v61, %v566_v60 }
 0x155   : > { %v2297_v62 = vpop.f32.mrf.mxu0 }
 0x156   : > { %v2317_v63 = vpop.f32.mrf.mxu1 }
 0x157   : > { %v776_v0 = vpop.f32.mrf.mxu0  ;;  %v882_v23 = vadd.f32 %v2317_v63, %v2297_v62 }
 0x158   : > { %v873_v1 = vpop.f32.mrf.mxu1 }
 0x159   : > { %v2298_v2 = vpop.f32.mrf.mxu0  ;;  %v874_v28 = vadd.f32 %v873_v1, %v776_v0 }
 0x15a   : > { %v2318_v3 = vpop.f32.mrf.mxu1 }
 0x15b   : > { %v779_v4 = vpop.f32.mrf.mxu0  ;;  %v885_v29 = vadd.f32 %v2318_v3, %v2298_v2 }
 0x15c   : > { %v876_v5 = vpop.f32.mrf.mxu1 }
 0x15d   : > { %v877_v38 = vadd.f32 %v876_v5, %v779_v4 }
 0x175   : > { %v2337_v6 = vpop.f32.mrf.mxu0 }
 0x176   : > { %v2357_v7 = vpop.f32.mrf.mxu1  ;;  %v1012_v22 = vadd.f32 %v2337_v6, %v671_v19 }
 0x177   : > { %v995_v8 = vpop.f32.mrf.mxu0  ;;  %v1130_v30 = vadd.f32 %v2357_v7, %v882_v23 }
 0x178   : > { %v1113_v51 = vpop.f32.mrf.mxu1  ;;  %v1010_v26 = vadd.f32 %v995_v8, %v663_v21 }
 0x179   : > { %v2338_v9 = vpop.f32.mrf.mxu0  ;;  %v1128_v39 = vadd.f32 %v1113_v51, %v874_v28 }
 0x17a   : > { %v2358_v10 = vpop.f32.mrf.mxu1  ;;  %v1013_v34 = vadd.f32 %v2338_v9, %v674_v25 }
 0x17b   : > { %v998_v11 = vpop.f32.mrf.mxu0  ;;  %v1131_v40 = vadd.f32 %v2358_v10, %v885_v29 }
 0x17c   : > { %v1116_v12 = vpop.f32.mrf.mxu1  ;;  %v1011_v43 = vadd.f32 %v998_v11, %v666_v33 }
 0x17d   : > { %v1129_v48 = vadd.f32 %v1116_v12, %v877_v38 }
 0x195   : > { %v2377_v13 = vpop.f32.mrf.mxu0 }
 0x196   : > { %v2397_v15 = vpop.f32.mrf.mxu1  ;;  %v1264_v14 = vadd.f32 %v2377_v13, %v1012_v22 }
 0x197   : > { %v1247_v16 = vpop.f32.mrf.mxu0  ;;  %v1382_v41 = vadd.f32 %v2397_v15, %v1130_v30 }
 0x198   : > { %v1365_v17 = vpop.f32.mrf.mxu1  ;;  %v1262_v35 = vadd.f32 %v1247_v16, %v1010_v26 }
 0x199   : > { %v2378_v18 = vpop.f32.mrf.mxu0  ;;  %v1380_v49 = vadd.f32 %v1365_v17, %v1128_v39 }
 0x19a   : > { %v2398_v20 = vpop.f32.mrf.mxu1  ;;  %v1265_v44 = vadd.f32 %v2378_v18, %v1013_v34 }
 0x19b   : > { %v1250_v24 = vpop.f32.mrf.mxu0  ;;  %v1383_v50 = vadd.f32 %v2398_v20, %v1131_v40 }
 0x19c   : > { %v1368_v27 = vpop.f32.mrf.mxu1  ;;  %v1263_v54 = vadd.f32 %v1250_v24, %v1011_v43 }
 0x19d   : > { %v1381_v60 = vadd.f32 %v1368_v27, %v1129_v48 }
 0x1b5   : > { %v2417_v31 = vpop.f32.mrf.mxu0 }
 0x1b6   : > { %v1508_v36 = vadd.f32 %v2417_v31, %v1264_v14  ;;  %v2437_v37 = vpop.f32.mrf.mxu1 }
 0x1b7   : > { %v1491_v42 = vpop.f32.mrf.mxu0  ;;  %v1626_v52 = vadd.f32 %v2437_v37, %v1382_v41 }
 0x1b8   : > { %v3097_v45 = vadd.f32 %v2080_v32, %v1508_v36  ;;  %v1506_v46 = vadd.f32 %v1491_v42, %v1262_v35  ;;  %v1609_v47 = vpop.f32.mrf.mxu1 }
 0x1b9   : > { %v2418_v53 = vpop.f32.mrf.mxu0  ;;  %v1624_v61 = vadd.f32 %v1609_v47, %v1380_v49  ;;  %v1676_v4 = vadd.f32 %v2085_v56, %v1626_v52 }
 0x1ba   : > { %v2083_v55 = vmul.f32 -1.442695, %v3097_v45  ;;  %v3104_v57 = vadd.f32 %v2080_v32, %v1506_v46  ;;  %v1509_v58 = vadd.f32 %v2418_v53, %v1265_v44  ;;  %v2438_v59 = vpop.f32.mrf.mxu1 }
 0x1bb   : > { %v1627_v62 = vadd.f32 %v2438_v59, %v1383_v50  ;;  %v1494_v63 = vpop.f32.mrf.mxu0  ;;  %v1674_v51 = vadd.f32 %v2085_v56, %v1624_v61 }
 0x1bc   : > { %2624 = vpow2.f32 %v2083_v55  ;;  %v2081_v0 = vmul.f32 -1.442695, %v3104_v57  ;;  %v3107_v1 = vadd.f32 %v2080_v32, %v1509_v58  ;;  %v1507_v2 = vadd.f32 %v1494_v63, %v1263_v54  ;;  %v1612_v3 = vpop.f32.mrf.mxu1 }
 0x1bd   : > { %v1677_v5 = vadd.f32 %v2085_v56, %v1627_v62  ;;  %v1625_v6 = vadd.f32 %v1612_v3, %v1381_v60 }
 0x1be   : > { %2626 = vpow2.f32 %v2081_v0  ;;  %v2084_v7 = vmul.f32 -1.442695, %v3107_v1  ;;  %v3113_v8 = vadd.f32 %v2080_v32, %v1507_v2 }
 0x1bf   : > { %v2135_v9 = vpack.c.bf16 %v1677_v5, %v1676_v4  ;;  %v1675_v10 = vadd.f32 %v2085_v56, %v1625_v6 }
 0x1c0   : > { %2628 = vpow2.f32 %v2084_v7  ;;  %v2082_v11 = vmul.f32 -1.442695, %v3113_v8 }
 0x1c1   : > { %2138 = vst [vmem:[%s371_s16 + $0x8] sm:$0xff] %v2135_v9   ;;  %v2130_v12 = vpack.c.bf16 %v1675_v10, %v1674_v51 }
 0x1c2   : > { %2630 = vpow2.f32 %v2082_v11 }
 0x1c3   : > { %2131 = vst [vmem:[%s371_s16] sm:$0xff] %v2130_v12  }
 0x1c4   : > { %2720 = shalt.err (!%p2717_p9)
}
 0x1c5   : > { %s2721_s16 = scalar_lea.hbm %s3124_s25, 256  ;;  %s2725_s23 = scalar_lea.hbm %s3241_s7, 512 }
 0x1c6   : > { %p2722_p1 = scmp.ne.s32.totalorder %s3124_s25, %s2721_s16  ;;  %p2726_p2 = scmp.lt.s32.totalorder %s3124_s25, %s3241_s7 }
 0x1c7   : > { %p2727_p13 = scmp.lt.s32.totalorder %s2725_s23, %s2721_s16 }
 0x1c8   : > { %p2723_p12 = pnand %p2722_p1, %p3266_p4 }
 0x1c9   : > { %p2728_p3 = por %p2727_p13, %p2726_p2 }
 0x1ca   : > { %p2724_p0 = pneg %p2723_p12 }
 0x1cc   : > { %p2729_p11 = pnand %p2728_p3, %p2724_p0 }
 0x1ce   : > { %2732 = shalt.err (!%p2729_p11)
}
 0x1cf   : > { %s3249_s26 = smov 64   ;;  %s3250_s21 = smov 4   ;;  %v2625_v13 = vpop.eup %2624  ;;  %v1678_v22 = vlaneseq  ;;  %v2861_v34 = vmov 0.0  }
 0x1d0   : > { %2453 = dma.vmem_to_hbm [thread:$0]  (%p3266_p4), %s3116_s0, 256, %s3124_s25, %s3126_s20, %s3249_s26, %s3249_s26, %s3250_s21   ;;  %v1653_v15 = vadd.f32 1.0, %v2625_v13  ;;  %v2627_v16 = vpop.eup %2626 }
 0x1d1   : > { %v1651_v17 = vadd.f32 1.0, %v2627_v16  ;;  %v2629_v18 = vpop.eup %2628  ;;  %s1688_s19 = sld [smem:[#allocation2 + %s2843_s30]]  ;;  %v1679_v23 = vshrl.u32 %v1678_v22, 7  ;;  %s3267_s0 = sshll.u32 %s3095_s24, 4 }
 0x1d2   : > { %2632 = vrcp.f32 %v1653_v15  ;;  %v1654_v19 = vadd.f32 1.0, %v2629_v18  ;;  %v2631_v20 = vpop.eup %2630  ;;  %s364_s25 = scalar_lea.vmem [#allocation9], %s3267_s0  ;;  %s3268_s16 = sshll.u32 %s2843_s30, 8 }
 0x1d3   : > { %2634 = vrcp.f32 %v1651_v17  ;;  %v1652_v21 = vadd.f32 1.0, %v2631_v20  ;;  %v1680_v24 = vadd.s32 8, %v1679_v23  ;;  %v1681_v26 = vadd.s32 16, %v1679_v23  ;;  %s1781_s14 = sshll.u32 %s364_s25, 4  ;;  %s3164_s23 = scalar_lea.hbm %s3240_s6, %s3268_s16  ;;  %s3166_s14 = int_to_ptr.vmem [resolvable:$true] %s1781_s14 }
 0x1d4   : > { %2636 = vrcp.f32 %v1654_v19  ;;  %v1682_v28 = vadd.s32 24, %v1679_v23  ;;  %s1757_s22 = scalar_lea.sflag [#allocation4], %s3095_s24  ;;  %s2862_s0 = smov [#allocation9]  }
 0x1d5   : > { %2638 = vrcp.f32 %v1652_v21  ;;  %s2737_s26 = sshll.u32 %s2862_s0, 4  ;;  %s2738_s26 = int_to_ptr.vmem [resolvable:$false] %s2737_s26 }
 0x1d6   : > { %s2739_s16 = scalar_lea.vmem %s2738_s26, 512  ;;  %p2740_p6 = scmp.lt.s32.totalorder %s3166_s14, %s2738_s26 }
 0x1d7   : > { %v1689_v27 = vstv %s1688_s19  ;;  %s2733_s19 = scalar_lea.vmem %s3166_s14, 256 }
 0x1d8   : > { %vm1690_vm4 = vcmp.lt.s32.totalorder %v1679_v23, %v1689_v27  ;;  %vm1691_vm5 = vcmp.lt.s32.totalorder %v1680_v24, %v1689_v27  ;;  %vm1692_vm6 = vcmp.lt.s32.totalorder %v1681_v26, %v1689_v27  ;;  %vm1693_vm7 = vcmp.lt.s32.totalorder %v1682_v28, %v1689_v27  ;;  %p2734_p8 = scmp.ne.s32.totalorder %s3166_s14, %s2733_s19  ;;  %p2741_p7 = scmp.lt.s32.totalorder %s2739_s16, %s2733_s19 }
 0x1d9   : > { %v2086_v35 = vsel %vm1690_vm4, 1.0, %v2861_v34  ;;  %v2087_v36 = vsel %vm1691_vm5, 1.0, %v2861_v34  ;;  %v2088_v39 = vsel %vm1692_vm6, 1.0, %v2861_v34  ;;  %v2089_v43 = vsel %vm1693_vm7, 1.0, %v2861_v34 }
 0x1da   : > { %p2735_p10 = pnand %p2734_p8, %p3266_p4  ;;  %p2742_p9 = por %p2741_p7, %p2740_p6 }
 0x1dc   : > { %p2736_p5 = pneg %p2735_p10 }
 0x1de   : > { %p2743_p1 = pnand %p2742_p9, %p2736_p5 }
 0x1df   : > { %v2633_v25 = vpop.eup %2632 }
 0x1e0   : > { %v2635_v14 = vpop.eup %2634  ;;  %v1665_v30 = vmul.f32 %v2633_v25, %v3097_v45 }
 0x1e1   : > { %v2637_v29 = vpop.eup %2636  ;;  %v1663_v31 = vmul.f32 %v2635_v14, %v3104_v57 }
 0x1e2   : > { %v1666_v32 = vmul.f32 %v2637_v29, %v3107_v1  ;;  %v2639_v33 = vpop.eup %2638  ;;  %v1704_v44 = vmul.f32 %v2088_v39, %v1665_v30 }
 0x1e3   : > { %v1664_v38 = vmul.f32 %v2639_v33, %v3113_v8  ;;  %v1702_v40 = vmul.f32 %v2086_v35, %v1663_v31 }
 0x1e4   : > { %v2125_v37 = vpack.c.bf16 %v1666_v32, %v1665_v30 }
 0x1e5   : > { %v1703_v41 = vmul.f32 %v2087_v36, %v1664_v38  ;;  %v2120_v42 = vpack.c.bf16 %v1664_v38, %v1663_v31 }
 0x1e6   : > { %2137 = vst [vmem:[%s364_s25 + $0x8] sm:$0xff] %v2125_v37  }
 0x1e7   : > { %v1706_v45 = vadd.f32 %v1703_v41, %v1702_v40  ;;  %2121 = vst [vmem:[%s364_s25] sm:$0xff] %v2120_v42  }
 0x1e8   : > { %2746 = shalt.err (!%p2743_p1)
}
 0x1e9   : > { %s2747_s25 = scalar_lea.hbm %s3164_s23, 256  ;;  %s2751_s0 = scalar_lea.hbm %s3240_s6, 512 }
 0x1ea   : > { %p2748_p12 = scmp.ne.s32.totalorder %s3164_s23, %s2747_s25  ;;  %p2752_p13 = scmp.lt.s32.totalorder %s3164_s23, %s3240_s6 }
 0x1eb   : > { %p2753_p3 = scmp.lt.s32.totalorder %s2751_s0, %s2747_s25 }
 0x1ec   : > { %p2749_p0 = pnand %p2748_p12, %p3266_p4 }
 0x1ed   : > { %p2754_p11 = por %p2753_p3, %p2752_p13 }
 0x1ee   : > { %p2750_p2 = pneg %p2749_p0 }
 0x1f0   : > { %p2755_p8 = pnand %p2754_p11, %p2750_p2 }
 0x1f2   : > { %2758 = shalt.err (!%p2755_p8)
}
 0x1f3   : > { %s3269_s26 = smov 4   ;;  %s3270_s19 = smov 64   ;;  %v1705_v46 = vmul.f32 %v2089_v43, %v1666_v32  ;;  %v1707_v47 = vadd.f32 %v1706_v45, %v1704_v44 }
 0x1f4   : > { %2452 = dma.vmem_to_hbm [thread:$0]  (%p3266_p4), %s3166_s14, 256, %s3164_s23, %s1757_s22, %s3270_s19, %s3270_s19, %s3269_s26  }
 0x1f5   : > { %v1708_v48 = vadd.f32 %v1707_v47, %v1705_v46  ;;  %s2104_s1 = sshll.u32 %s2843_s30, 4  ;;  %s377_s21 = scalar_lea.vmem [#allocation12], %s3095_s24 }
 0x1f6   : > { %s1816_s16 = sshll.u32 %s377_s21, 4  ;;  %s1814_s11 = scalar_lea.hbm %s3242_s8, %s2104_s1  ;;  %s1817_s16 = int_to_ptr.vmem [resolvable:$true] %s1816_s16 }
 0x1f7   : > { %v1709_v49 = vrot.slane %v1708_v48, 4  ;;  %s2759_s14 = scalar_lea.vmem %s1817_s16, 16  ;;  %s2863_s23 = smov [#allocation12]  }
 0x1f8   : > { %p2760_p10 = scmp.ne.s32.totalorder %s1817_s16, %s2759_s14  ;;  %s2763_s22 = sshll.u32 %s2863_s23, 4  ;;  %s2764_s22 = int_to_ptr.vmem [resolvable:$false] %s2763_s22 }
 0x1f9   : > { %v1710_v50 = vadd.f32 %v1709_v49, %v1708_v48  ;;  %s2765_s0 = scalar_lea.vmem %s2764_s22, 32  ;;  %p2766_p7 = scmp.lt.s32.totalorder %s1817_s16, %s2764_s22 }
 0x1fa   : > { %p2761_p5 = pnand %p2760_p10, %p3266_p4  ;;  %p2767_p9 = scmp.lt.s32.totalorder %s2765_s0, %s2759_s14 }
 0x1fb   : > { %v1711_v52 = vrot.slane %v1710_v50, 2 }
 0x1fc   : > { %p2762_p6 = pneg %p2761_p5  ;;  %p2768_p1 = por %p2767_p9, %p2766_p7 }
 0x1fd   : > { %v1712_v53 = vadd.f32 %v1711_v52, %v1710_v50 }
 0x1fe   : > { %p2769_p12 = pnand %p2768_p1, %p2762_p6 }
 0x1ff   : > { %v1713_v54 = vrot.slane %v1712_v53, 1 }
 0x201   : > { %v1714_v55 = vadd.f32 %v1713_v54, %v1712_v53 }
 0x203   : > { %1715 = vst [vmem:[%s377_s21] sm:$0x1] %v1714_v55 }
 0x204   : > { %2772 = shalt.err (!%p2769_p12)
}
 0x205   : > { %s2773_s30 = scalar_lea.hbm %s1814_s11, 16  ;;  %s2777_s19 = scalar_lea.hbm %s3242_s8, 32 }
 0x206   : > { %p2774_p0 = scmp.ne.s32.totalorder %s1814_s11, %s2773_s30  ;;  %p2778_p3 = scmp.lt.s32.totalorder %s1814_s11, %s3242_s8 }
 0x207   : > { %p2779_p11 = scmp.lt.s32.totalorder %s2777_s19, %s2773_s30 }
 0x208   : > { %p2775_p2 = pnand %p2774_p0, %p3266_p4 }
 0x209   : > { %p2780_p8 = por %p2779_p11, %p2778_p3 }
 0x20a   : > { %p2776_p13 = pneg %p2775_p2 }
 0x20c   : > { %p2781_p10 = pnand %p2780_p8, %p2776_p13 }
 0x20e   : > { %2784 = shalt.err (!%p2781_p10)
}
 0x20f   : > { %2454 = dma.vmem_to_hbm [thread:$0]  (%p3266_p4), %s1817_s16, 16, %s1814_s11, %s3126_s20  }
 0x210 PF: > { %p2484_p5 = scmp.ge.s32.totalorder %s2851_s10, 2  ;;  %s1828_s25 = sand.u32 1, %s2831_s27  }
 0x211   : > { %p3271_p6 = scmp.ne.s32.totalorder %s3254_s17, 0  ;;  %s1829_s12 = scalar_lea.sflag [#allocation4], %s1828_s25 }
 0x213   : > { %p2469_p7 = pnand %p2484_p5, %p3271_p6 }
 0x215   : > { %p2470_p9 = pneg %p2469_p7 }
 0x217   : > { %2822 = dma.done.wait (%p2470_p9), %s1829_s12, 256  }
 0x218   : > { %2824 = vsyncadd (%p2470_p9), %s1829_s12, 4294967040  ;;  %s3272_s14 = sadd.s32 4294967294, %s2851_s10  }
 0x219   : > { %s1837_s23 = sand.u32 1, %s3272_s14  }
 0x21a   : > { %s1838_s22 = scalar_lea.sflag [#allocation11], %s1837_s23 }
 0x21b   : > { %2826 = dma.done.wait (%p2470_p9), %s1838_s22, 272  }
 0x21c   : > { %2828 = vsyncadd (%p2470_p9), %s1838_s22, 4294967024  ;;  %s28_s10 = sadd.s32 1, %s2851_s10   ;;  %s3273_s27 = smov %s2835_s28 }
 0x21d   : > { %p25_p4 = scmp.ge.s32.totalorder %s28_s10, 4   ;;  %s3274_s28 = smov %s2839_s29 }
 0x21e   : > { %s3275_s29 = smov %s2967_s18  ;;  %s3276_s30 = smov %s2847_s9 }
 0x21f   : > { %s3277_s9 = smov %s3279_s13  ;;  %27 = sbr.rel (!%p25_p4) target bundleno = 12 (0xc), region = 134 }
 0x224   :  { %1851 = vsyncpa [#allocation3], 1 }
 0x225   :  { %1853 = vsyncpa [#allocation3 + $0x1], 1 }
 0x226   :  { %1854 = vsyncpa [#allocation8], 1 }
 0x227   :  { %1855 = vsyncpa [#allocation4], 1 }
 0x228   :  { %1857 = vsyncpa [#allocation4 + $0x1], 1 }
 0x229   :  { %1858 = vsyncpa [#allocation11], 1 }
 0x22a   :  { %1860 = vsyncpa [#allocation11 + $0x1], 1 }
 0x22b   :  { %1861 = vsyncpa [#allocation5], 1 }
 0x22c   :  { %1863 = vsyncpa [#allocation5 + $0x1], 1 }

</bundles_post_ra>
